<compile_context>
chip_gen: v7x
topology: tpu7x:2x2x1
jax: 0.10.0
libtpu: 0.0.40
codegen_flags: <defaults>
</compile_context>

<pallas_src>
import functools

import jax
import jax.numpy as jnp
from jax.experimental import pallas as pl
from jax.experimental.pallas import tpu as pltpu

_EPS = 1e-5  # nn.BatchNorm1d default eps


def _round_up(n, m):
    return ((n + m - 1) // m) * m


def _classifier2_kernel(x_ref, w1_ref, w2_ref, b2_ref, g_ref, be_ref,
                        out_ref, sum_ref, sumsq_ref, *, inv_n):
    phase = pl.program_id(0)
    j = pl.program_id(1)

    # First matmul: bf16 inputs on the MXU, f32 accumulation.
    # Linear1 bias is omitted: (h + b) - mean(h + b) == h - mean(h), so it is
    # exactly cancelled by the following BatchNorm (and it is zero anyway).
    x_bf = x_ref[...].astype(jnp.bfloat16)
    h = jnp.dot(x_bf, w1_ref[...], preferred_element_type=jnp.float32)  # (TB, Hp) f32

    @pl.when(phase == 0)
    def _():
        @pl.when(j == 0)
        def _():
            sum_ref[...] = jnp.zeros_like(sum_ref)
            sumsq_ref[...] = jnp.zeros_like(sumsq_ref)
        sum_ref[...] += jnp.sum(h, axis=0, keepdims=True)
        sumsq_ref[...] += jnp.sum(h * h, axis=0, keepdims=True)

    @pl.when(phase == 1)
    def _():
        # Exact full-batch BatchNorm1d (train mode): biased variance, eps=1e-5.
        mu = sum_ref[...] * inv_n
        var = jnp.maximum(sumsq_ref[...] * inv_n - mu * mu, 0.0)
        hn = (h - mu) * jax.lax.rsqrt(var + _EPS) * g_ref[...] + be_ref[...]
        # TODO(synk): nn.Dropout is stochastic in train mode (needs torch RNG); identity here.
        a = jnp.maximum(hn, 0.0)
        out_ref[...] = (
            jnp.dot(a.astype(jnp.bfloat16), w2_ref[...],
                    preferred_element_type=jnp.float32)
            + b2_ref[...]
        )


def classifier2_forward(params, x, *, batch_tile=128):
    """Classifier2.forward via a single two-phase Pallas call.

    params: dict with w1 (in,hidden), w2 (hidden,out), b2 (1,out),
            g/be (1,hidden) BatchNorm affine.  (b1 is cancelled by BN.)
    """
    w1, w2 = params["w1"], params["w2"]
    b2, g, be = params["b2"], params["g"], params["be"]

    B, K = x.shape
    H = w1.shape[1]
    O = w2.shape[1]

    # Lane-dense / MXU-friendly padding of feature dims; 8-aligned batch tiles.
    K_p = _round_up(K, 128)
    H_p = _round_up(H, 128)
    O_p = _round_up(O, 128)
    TB = batch_tile if B >= batch_tile else _round_up(B, 8)
    B_p = _round_up(B, TB)
    n_tiles = B_p // TB

    # Zero padding is exact (see kernel comment); padded output rows/cols are sliced off.
    x_p = jnp.pad(x.astype(jnp.float32), ((0, B_p - B), (0, K_p - K)))
    w1_p = jnp.pad(w1, ((0, K_p - K), (0, H_p - H))).astype(jnp.bfloat16)
    w2_p = jnp.pad(w2, ((0, H_p - H), (0, O_p - O))).astype(jnp.bfloat16)
    b2_p = jnp.pad(b2, ((0, 0), (0, O_p - O)))
    g_p = jnp.pad(g, ((0, 0), (0, H_p - H)))
    be_p = jnp.pad(be, ((0, 0), (0, H_p - H)))

    const = lambda p, j: (0, 0)        # resident params: DMA'd once
    tiled = lambda p, j: (j, 0)        # x / out: tiled over the batch

    out = pl.pallas_call(
        functools.partial(_classifier2_kernel, inv_n=1.0 / B),
        out_shape=jax.ShapeDtypeStruct((B_p, O_p), jnp.float32),
        grid_spec=pltpu.PrefetchScalarGridSpec(
            num_scalar_prefetch=0,
            grid=(2, n_tiles),                       # (phase, batch tile)
            in_specs=[
                pl.BlockSpec((TB, K_p), tiled),      # x
                pl.BlockSpec((K_p, H_p), const),     # w1 (bf16)
                pl.BlockSpec((H_p, O_p), const),     # w2 (bf16)
                pl.BlockSpec((1, O_p), const),       # b2
                pl.BlockSpec((1, H_p), const),       # gamma
                pl.BlockSpec((1, H_p), const),       # beta
            ],
            out_specs=pl.BlockSpec((TB, O_p), tiled),
            scratch_shapes=[pltpu.VMEM((1, H_p), jnp.float32),   # sum
                            pltpu.VMEM((1, H_p), jnp.float32)],  # sum of squares
        ),
        compiler_params=pltpu.CompilerParams(
            # Both axes sequential: phase-0 accumulation feeds phase-1, and the
            # cross-tile BN stat accumulation needs a single shared scratch.
            dimension_semantics=("arbitrary", "arbitrary"),
            vmem_limit_bytes=32 * 1024 * 1024,       # safe on v5e/v6e/v7x
        ),
    )(x_p, w1_p, w2_p, b2_p, g_p, be_p)

    return out[:B, :O]


def classifier2_reference(params, x):
    """Pure-JAX reference mirroring the kernel numerics (bf16 MXU, f32 elsewhere)."""
    w1 = params["w1"].astype(jnp.bfloat16)
    w2 = params["w2"].astype(jnp.bfloat16)
    h = jnp.dot(x.astype(jnp.bfloat16), w1, preferred_element_type=jnp.float32)
    mu = jnp.mean(h, axis=0, keepdims=True)
    var = jnp.mean((h - mu) ** 2, axis=0, keepdims=True)   # biased (train-mode BN)
    hn = (h - mu) * jax.lax.rsqrt(var + _EPS) * params["g"] + params["be"]
    a = jnp.maximum(hn, 0.0)
    return (jnp.dot(a.astype(jnp.bfloat16), w2, preferred_element_type=jnp.float32)
            + params["b2"])


def _kaiming_uniform(key, fan_in, fan_out):
    # nn.init.kaiming_uniform_ default (a=0, fan_in, leaky_relu): bound = sqrt(6 / fan_in)
    bound = (6.0 / fan_in) ** 0.5
    return jax.random.uniform(key, (fan_in, fan_out), jnp.float32, -bound, bound)


def make_params(key, in_shape=64, hidden=64, out_shape=9):
    k1, k2 = jax.random.split(key)
    return {
        # Linear weights stored (in, out) so y = x @ W + b; biases zeroed (random_init).
        "w1": _kaiming_uniform(k1, in_shape, hidden),
        "b1": jnp.zeros((1, hidden), jnp.float32),   # kept for fidelity; cancelled by BN
        "w2": _kaiming_uniform(k2, hidden, out_shape),
        "b2": jnp.zeros((1, out_shape), jnp.float32),
        # BatchNorm1d affine params (default init: gamma=1, beta=0)
        "g": jnp.ones((1, hidden), jnp.float32),
        "be": jnp.zeros((1, hidden), jnp.float32),
    }


if __name__ == "__main__":
    # Classifier2(in_shape=64, hidden=64, out_shape=9); small batch, non-multiple of the
    # tile to exercise batch padding and the multi-tile BN accumulation path.
    B, in_shape, hidden, out_shape = 40, 64, 64, 9

    key = jax.random.PRNGKey(0)
    pkey, xkey = jax.random.split(key)
    params = make_params(pkey, in_shape, hidden, out_shape)
    x = jax.random.normal(xkey, (B, in_shape), jnp.float32)

    out = classifier2_forward(params, x, batch_tile=16)   # 3 batch tiles of 16 (padded)
    jax.block_until_ready(out)

    assert out.shape == (B, out_shape)
    assert bool(jnp.all(jnp.isfinite(out)))

    ref = classifier2_reference(params, x)
    max_err = float(jnp.max(jnp.abs(out - ref)))
    assert jnp.allclose(out, ref, atol=2e-2, rtol=2e-2), f"max abs err {max_err}"

    print("KERNEL_OK")
</pallas_src>

<mosaic_0001>
module attributes {stable_mosaic.version = 11 : i64} {
  func.func @_classifier2_kernel(%arg0: i32, %arg1: i32, %arg2: memref<16x128xf32, #tpu.memory_space<vmem>>, %arg3: memref<128x128xbf16, #tpu.memory_space<vmem>>, %arg4: memref<128x128xbf16, #tpu.memory_space<vmem>>, %arg5: memref<1x128xf32, #tpu.memory_space<vmem>>, %arg6: memref<1x128xf32, #tpu.memory_space<vmem>>, %arg7: memref<1x128xf32, #tpu.memory_space<vmem>>, %arg8: memref<16x128xf32, #tpu.memory_space<vmem>>, %arg9: memref<1x128xf32, #tpu.memory_space<vmem>>, %arg10: memref<1x128xf32, #tpu.memory_space<vmem>>) attributes {dimension_semantics = [#tpu.dimension_semantics<arbitrary>, #tpu.dimension_semantics<arbitrary>], iteration_bounds = array<i64: 2, 3>, scalar_prefetch = 0 : i64, scratch_operands = 2 : i64, tpu.core_type = #tpu.core_type<tc>, window_params = [{transform_indices = @transform_0, window_bounds = array<i64: 16, 128>}, {pipeline_mode = #tpu.pipeline_mode<synchronous>, transform_indices = @transform_1, window_bounds = array<i64: 128, 128>}, {pipeline_mode = #tpu.pipeline_mode<synchronous>, transform_indices = @transform_2, window_bounds = array<i64: 128, 128>}, {pipeline_mode = #tpu.pipeline_mode<synchronous>, transform_indices = @transform_3, window_bounds = array<i64: 1, 128>}, {pipeline_mode = #tpu.pipeline_mode<synchronous>, transform_indices = @transform_4, window_bounds = array<i64: 1, 128>}, {pipeline_mode = #tpu.pipeline_mode<synchronous>, transform_indices = @transform_5, window_bounds = array<i64: 1, 128>}, {transform_indices = @transform_6, window_bounds = array<i64: 16, 128>}]} {
    %c0 = arith.constant 0 : index
    %c0_0 = arith.constant 0 : index
    %0 = vector.load %arg2[%c0, %c0_0] : memref<16x128xf32, #tpu.memory_space<vmem>>, vector<16x128xf32>
    %1 = arith.truncf %0 : vector<16x128xf32> to vector<16x128xbf16>
    %c0_1 = arith.constant 0 : index
    %c0_2 = arith.constant 0 : index
    %2 = vector.load %arg3[%c0_1, %c0_2] : memref<128x128xbf16, #tpu.memory_space<vmem>>, vector<128x128xbf16>
    %cst = arith.constant dense<0.000000e+00> : vector<16x128xf32>
    %3 = tpu.matmul %1, %2, %cst {dimension_numbers = #tpu.dot_dimension_numbers<[1], [0], [0], [1], [0, 0, 1, 1], [], []>} : vector<16x128xbf16>, vector<128x128xbf16>, vector<16x128xf32> -> vector<16x128xf32>
    %c0_i32 = arith.constant 0 : i32
    %4 = arith.cmpi eq, %arg0, %c0_i32 : i32
    %5 = arith.extui %4 : i1 to i32
    %c0_i32_3 = arith.constant 0 : i32
    %6 = arith.cmpi ne, %5, %c0_i32_3 : i32
    scf.if %6 {
      %c0_i32_5 = arith.constant 0 : i32
      %10 = arith.cmpi eq, %arg1, %c0_i32_5 : i32
      %11 = arith.extui %10 : i1 to i32
      %c0_i32_6 = arith.constant 0 : i32
      %12 = arith.cmpi ne, %11, %c0_i32_6 : i32
      scf.if %12 {
        %cst_17 = arith.constant 0.000000e+00 : f32
        %24 = vector.broadcast %cst_17 : f32 to vector<1x128xf32>
        %c0_18 = arith.constant 0 : index
        %c0_19 = arith.constant 0 : index
        %25 = vector.load %arg9[%c0_18, %c0_19] : memref<1x128xf32, #tpu.memory_space<vmem>>, vector<1x128xf32>
        tpu.vector_store %arg9[%c0_18, %c0_19], %24 {strides = array<i32>} : memref<1x128xf32, #tpu.memory_space<vmem>>, vector<1x128xf32>,
        %cst_20 = arith.constant 0.000000e+00 : f32
        %26 = vector.broadcast %cst_20 : f32 to vector<1x128xf32>
        %c0_21 = arith.constant 0 : index
        %c0_22 = arith.constant 0 : index
        %27 = vector.load %arg10[%c0_21, %c0_22] : memref<1x128xf32, #tpu.memory_space<vmem>>, vector<1x128xf32>
        tpu.vector_store %arg10[%c0_21, %c0_22], %26 {strides = array<i32>} : memref<1x128xf32, #tpu.memory_space<vmem>>, vector<1x128xf32>,
      } else {
      }
      %c0_7 = arith.constant 0 : index
      %c0_8 = arith.constant 0 : index
      %13 = vector.load %arg9[%c0_7, %c0_8] : memref<1x128xf32, #tpu.memory_space<vmem>>, vector<1x128xf32>
      %cst_9 = arith.constant dense<0.000000e+00> : vector<128xf32>
      %14 = vector.multi_reduction <add>, %3, %cst_9 [0] : vector<16x128xf32> to vector<128xf32>
      %15 = vector.shape_cast %14 : vector<128xf32> to vector<1x128xf32>
      %16 = arith.addf %13, %15 : vector<1x128xf32>
      %c0_10 = arith.constant 0 : index
      %c0_11 = arith.constant 0 : index
      %17 = vector.load %arg9[%c0_10, %c0_11] : memref<1x128xf32, #tpu.memory_space<vmem>>, vector<1x128xf32>
      tpu.vector_store %arg9[%c0_10, %c0_11], %16 {strides = array<i32>} : memref<1x128xf32, #tpu.memory_space<vmem>>, vector<1x128xf32>,
      %c0_12 = arith.constant 0 : index
      %c0_13 = arith.constant 0 : index
      %18 = vector.load %arg10[%c0_12, %c0_13] : memref<1x128xf32, #tpu.memory_space<vmem>>, vector<1x128xf32>
      %19 = arith.mulf %3, %3 : vector<16x128xf32>
      %cst_14 = arith.constant dense<0.000000e+00> : vector<128xf32>
      %20 = vector.multi_reduction <add>, %19, %cst_14 [0] : vector<16x128xf32> to vector<128xf32>
      %21 = vector.shape_cast %20 : vector<128xf32> to vector<1x128xf32>
      %22 = arith.addf %18, %21 : vector<1x128xf32>
      %c0_15 = arith.constant 0 : index
      %c0_16 = arith.constant 0 : index
      %23 = vector.load %arg10[%c0_15, %c0_16] : memref<1x128xf32, #tpu.memory_space<vmem>>, vector<1x128xf32>
      tpu.vector_store %arg10[%c0_15, %c0_16], %22 {strides = array<i32>} : memref<1x128xf32, #tpu.memory_space<vmem>>, vector<1x128xf32>,
    } else {
    }
    %c1_i32 = arith.constant 1 : i32
    %7 = arith.cmpi eq, %arg0, %c1_i32 : i32
    %8 = arith.extui %7 : i1 to i32
    %c0_i32_4 = arith.constant 0 : i32
    %9 = arith.cmpi ne, %8, %c0_i32_4 : i32
    scf.if %9 {
      %c0_5 = arith.constant 0 : index
      %c0_6 = arith.constant 0 : index
      %10 = vector.load %arg9[%c0_5, %c0_6] : memref<1x128xf32, #tpu.memory_space<vmem>>, vector<1x128xf32>
      %cst_7 = arith.constant 2.500000e-02 : f32
      %11 = vector.broadcast %cst_7 : f32 to vector<1x128xf32>
      %12 = arith.mulf %10, %11 : vector<1x128xf32>
      %c0_8 = arith.constant 0 : index
      %c0_9 = arith.constant 0 : index
      %13 = vector.load %arg10[%c0_8, %c0_9] : memref<1x128xf32, #tpu.memory_space<vmem>>, vector<1x128xf32>
      %cst_10 = arith.constant 2.500000e-02 : f32
      %14 = vector.broadcast %cst_10 : f32 to vector<1x128xf32>
      %15 = arith.mulf %13, %14 : vector<1x128xf32>
      %16 = arith.mulf %12, %12 : vector<1x128xf32>
      %17 = arith.subf %15, %16 : vector<1x128xf32>
      %cst_11 = arith.constant 0.000000e+00 : f32
      %18 = vector.broadcast %cst_11 : f32 to vector<1x128xf32>
      %19 = arith.maximumf %17, %18 : vector<1x128xf32>
      %20 = vector.broadcast %12 : vector<1x128xf32> to vector<16x128xf32>
      %21 = arith.subf %3, %20 : vector<16x128xf32>
      %cst_12 = arith.constant 9.99999974E-6 : f32
      %22 = vector.broadcast %cst_12 : f32 to vector<1x128xf32>
      %23 = arith.addf %19, %22 : vector<1x128xf32>
      %24 = math.rsqrt %23 : vector<1x128xf32>
      %25 = vector.broadcast %24 : vector<1x128xf32> to vector<16x128xf32>
      %26 = arith.mulf %21, %25 : vector<16x128xf32>
      %c0_13 = arith.constant 0 : index
      %c0_14 = arith.constant 0 : index
      %27 = vector.load %arg6[%c0_13, %c0_14] : memref<1x128xf32, #tpu.memory_space<vmem>>, vector<1x128xf32>
      %28 = vector.broadcast %27 : vector<1x128xf32> to vector<16x128xf32>
      %29 = arith.mulf %26, %28 : vector<16x128xf32>
      %c0_15 = arith.constant 0 : index
      %c0_16 = arith.constant 0 : index
      %30 = vector.load %arg7[%c0_15, %c0_16] : memref<1x128xf32, #tpu.memory_space<vmem>>, vector<1x128xf32>
      %31 = vector.broadcast %30 : vector<1x128xf32> to vector<16x128xf32>
      %32 = arith.addf %29, %31 : vector<16x128xf32>
      %cst_17 = arith.constant 0.000000e+00 : f32
      %33 = vector.broadcast %cst_17 : f32 to vector<16x128xf32>
      %34 = arith.maximumf %32, %33 : vector<16x128xf32>
      %35 = arith.truncf %34 : vector<16x128xf32> to vector<16x128xbf16>
      %c0_18 = arith.constant 0 : index
      %c0_19 = arith.constant 0 : index
      %36 = vector.load %arg4[%c0_18, %c0_19] : memref<128x128xbf16, #tpu.memory_space<vmem>>, vector<128x128xbf16>
      %cst_20 = arith.constant dense<0.000000e+00> : vector<16x128xf32>
      %37 = tpu.matmul %35, %36, %cst_20 {dimension_numbers = #tpu.dot_dimension_numbers<[1], [0], [0], [1], [0, 0, 1, 1], [], []>} : vector<16x128xbf16>, vector<128x128xbf16>, vector<16x128xf32> -> vector<16x128xf32>
      %c0_21 = arith.constant 0 : index
      %c0_22 = arith.constant 0 : index
      %38 = vector.load %arg5[%c0_21, %c0_22] : memref<1x128xf32, #tpu.memory_space<vmem>>, vector<1x128xf32>
      %39 = vector.broadcast %38 : vector<1x128xf32> to vector<16x128xf32>
      %40 = arith.addf %37, %39 : vector<16x128xf32>
      %c0_23 = arith.constant 0 : index
      %c0_24 = arith.constant 0 : index
      %41 = vector.load %arg8[%c0_23, %c0_24] : memref<16x128xf32, #tpu.memory_space<vmem>>, vector<16x128xf32>
      tpu.vector_store %arg8[%c0_23, %c0_24], %40 {strides = array<i32>} : memref<16x128xf32, #tpu.memory_space<vmem>>, vector<16x128xf32>,
    } else {
    }
    return
  }
  func.func @transform_0(%arg0: i32, %arg1: i32) -> (i32, i32) {
    %c0_i32 = arith.constant 0 : i32
    %c0_i32_0 = arith.constant 0 : i32
    return %arg1, %c0_i32 : i32, i32
  }
  func.func @transform_1(%arg0: i32, %arg1: i32) -> (i32, i32) {
    %c0_i32 = arith.constant 0 : i32
    %c0_i32_0 = arith.constant 0 : i32
    %c0_i32_1 = arith.constant 0 : i32
    return %c0_i32, %c0_i32_0 : i32, i32
  }
  func.func @transform_2(%arg0: i32, %arg1: i32) -> (i32, i32) {
    %c0_i32 = arith.constant 0 : i32
    %c0_i32_0 = arith.constant 0 : i32
    %c0_i32_1 = arith.constant 0 : i32
    return %c0_i32, %c0_i32_0 : i32, i32
  }
  func.func @transform_3(%arg0: i32, %arg1: i32) -> (i32, i32) {
    %c0_i32 = arith.constant 0 : i32
    %c0_i32_0 = arith.constant 0 : i32
    %c0_i32_1 = arith.constant 0 : i32
    return %c0_i32, %c0_i32_0 : i32, i32
  }
  func.func @transform_4(%arg0: i32, %arg1: i32) -> (i32, i32) {
    %c0_i32 = arith.constant 0 : i32
    %c0_i32_0 = arith.constant 0 : i32
    %c0_i32_1 = arith.constant 0 : i32
    return %c0_i32, %c0_i32_0 : i32, i32
  }
  func.func @transform_5(%arg0: i32, %arg1: i32) -> (i32, i32) {
    %c0_i32 = arith.constant 0 : i32
    %c0_i32_0 = arith.constant 0 : i32
    %c0_i32_1 = arith.constant 0 : i32
    return %c0_i32, %c0_i32_0 : i32, i32
  }
  func.func @transform_6(%arg0: i32, %arg1: i32) -> (i32, i32) {
    %c0_i32 = arith.constant 0 : i32
    %c0_i32_0 = arith.constant 0 : i32
    return %arg1, %c0_i32 : i32, i32
  }
}

</mosaic_0001>

<bundles_post_ra>
// kernel: tpu_custom_call.1
= control target key start
LH: loop header
LB: loop body
LE: loop exit
PB: predicated region body
PF: predicated region fallthrough
CT: control target
= control target key end

     0   :  { %s1511_s0 = inlined_call_operand.hbm [shape: f32[48,128], index: 0, kind: input, shape index: {}]   ;;  %s1512_s1 = inlined_call_operand.hbm [shape: bf16[128,128], index: 1, kind: input, shape index: {}]   ;;  %s1513_s2 = inlined_call_operand.hbm [shape: bf16[128,128], index: 2, kind: input, shape index: {}]   ;;  %s1514_s3 = inlined_call_operand.vmem [shape: f32[1,128], index: 3, kind: input, shape index: {}]   ;;  %s1515_s4 = inlined_call_operand.vmem [shape: f32[1,128], index: 4, kind: input, shape index: {}]   ;;  %s1516_s5 = inlined_call_operand.vmem [shape: f32[1,128], index: 5, kind: input, shape index: {}]   ;;  %s1517_s6 = inlined_call_operand.hbm [shape: f32[48,128], index: 6, kind: output, shape index: {}]  }
   0x1   :  { %1525 = sst [smem:[#allocation16_spill]] %s1517_s6 }
   0x2   :  { %11 = vsyncpa [#allocation5], 0 }
   0x3   :  { %13 = vsyncpa [#allocation5 + $0x1], 0 }
   0x4   :  { %14 = vsyncpa [#allocation8], 0 }
   0x5   :  { %15 = vsyncpa [#allocation6], 0 }
   0x6   :  { %17 = vsyncpa [#allocation6 + $0x1], 0  ;;  %s1204_s21 = smov 0   ;;  %s1206_s22 = smov 0  }
   0x7   :  { %s1208_s23 = smov 0   ;;  %s1210_s24 = smov 0  }
   0x8   :  { %s1212_s25 = smov 0   ;;  %s1214_s26 = smov 0  }
   0x9   :  { %s1216_s27 = smov 0   ;;  %s1218_s28 = smov 0  }
   0xa LB: > { %1526 = sst [smem:[#allocation14_spill]] %s1124_s21  ;;  %s735_s29 = sadd.s32 4294967295, %s1152_s28   ;;  %s1152_s28 = sphi %s1218_s28, %s23_s28   ;;  %s1148_s27 = sphi %s1216_s27, %s1551_s27   ;;  %s1144_s26 = sphi %s1214_s26, %s1550_s26   ;;  %s1140_s25 = sphi %s1212_s25, %s1549_s25   ;;  %s1136_s24 = sphi %s1210_s24, %s1548_s24   ;;  %s1132_s23 = sphi %s1208_s23, %s1547_s23   ;;  %s1128_s22 = sphi %s1206_s22, %s1546_s22   ;;  %s1124_s21 = sphi %s1204_s21, %s1545_s21  }
   0xb   : > { %s736_s30 = sadd.s32 4294967294, %s1152_s28   ;;  %p55_p0 = scmp.ne.s32.totalorder %s1128_s22, %s1124_s21 }
   0xc   : > { %p1248_p1 = scmp.eq.s32.totalorder %s735_s29, 0  ;;  %p1252_p2 = scmp.eq.s32.totalorder %s735_s29, 5 }
   0xd   : > { %p190_p3 = scmp.eq.s32.totalorder %s736_s30, 5  ;;  %p737_p5 = scmp.ge.s32.totalorder %s1152_s28, 1 }
   0xe   : > { %s1527_s7 = scalar_select %p1248_p1, 1, 0 }
   0xf   : > { %s1528_s8 = scalar_select %p1252_p2, 1, 0 }
  0x10   : > { %p1258_p4 = por %p1248_p1, %p55_p0  ;;  %p1263_p6 = por %p190_p3, %p55_p0 }
  0x11   : > { %p197_p7 = scmp.lt.s32.totalorder %s1152_s28, 7  ;;  %s1154_s12 = smov [#allocation7]  }
  0x12   : > { %s1529_s9 = scalar_select %p1258_p4, 1, 0 }
  0x13   : > { %s1530_s10 = scalar_select %p1263_p6, 1, 0 }
  0x14   : > { %p1268_p8 = pnand %p737_p5, %p197_p7  ;;  %s209_s13 = sshll.u32 %s1154_s12, 4  ;;  %s210_s13 = int_to_ptr.vmem [resolvable:$true] %s209_s13 }
  0x15   : > { %1531 = sst [smem:[#allocation15_spill]] %s1530_s10  ;;  %s1155_s15 = smov [#allocation9]  }
  0x16   : > { %s1532_s11 = scalar_select %p1268_p8, 1, 0 }
  0x17   : > { %p848_p9 = pneg %p1268_p8  ;;  %s222_s16 = sshll.u32 %s1155_s15, 4  ;;  %s1280_s16 = int_to_ptr.vmem [resolvable:$true] %s222_s16 }
  0x18   : > { %s964_s19 = scalar_lea.hbm %s1512_s1, 1024 }
  0x19   : > { %p1276_p10 = pnand %p848_p9, %p1248_p1  ;;  %p965_p11 = scmp.ne.s32.totalorder %s1512_s1, %s964_s19 }
  0x1a   : > { %p971_p3 = scmp.lt.u32.totalorder %s964_s19, %s1512_s1 }
  0x1b   : > { %p966_p12 = pneg %p1276_p10 }
  0x1d   : > { %p967_p13 = pnand %p966_p12, %p965_p11 }
  0x1f   : > { %p968_p0 = pneg %p967_p13 }
  0x21   : > { %p973_p5 = pnand %p971_p3, %p968_p0 }
  0x23   : > { %976 = shalt.err (!%p973_p5)
}
  0x24   : > { %s977_s15 = scalar_lea.vmem %s210_s13, 1024  ;;  %p985_p1 = scmp.lt.s32.totalorder %s210_s13, %s210_s13 }
  0x25   : > { %p978_p7 = scmp.ne.s32.totalorder %s210_s13, %s977_s15  ;;  %p986_p4 = scmp.lt.s32.totalorder %s977_s15, %s977_s15 }
  0x27   : > { %p980_p9 = pnand %p978_p7, %p966_p12  ;;  %p987_p8 = por %p986_p4, %p985_p1 }
  0x29   : > { %p981_p6 = pneg %p980_p9 }
  0x2b   : > { %p988_p2 = pnand %p987_p8, %p981_p6 }
  0x2d   : > { %991 = shalt.err (!%p988_p2)
}
  0x2e   : > { %s1156_s17 = smov 64   ;;  %s1157_s18 = smov 4  }
  0x2f   : > { %851 = dma.hbm_to_vmem [thread:$0]  (!%p1276_p10), %s1512_s1, 1024, %s210_s13, [#allocation8], %s1156_s17, %s1156_s17, %s1157_s18  }
  0x30   : > { %s992_s12 = scalar_lea.hbm %s1513_s2, 1024 }
  0x31   : > { %p993_p11 = scmp.ne.s32.totalorder %s1513_s2, %s992_s12  ;;  %p999_p4 = scmp.lt.u32.totalorder %s992_s12, %s1513_s2 }
  0x33   : > { %p995_p1 = pnand %p993_p11, %p966_p12 }
  0x35   : > { %p996_p2 = pneg %p995_p1 }
  0x37   : > { %p1001_p6 = pnand %p999_p4, %p996_p2 }
  0x39   : > { %1004 = shalt.err (!%p1001_p6)
}
  0x3a   : > { %s1005_s13 = scalar_lea.vmem %s1280_s16, 1024  ;;  %p1013_p3 = scmp.lt.s32.totalorder %s1280_s16, %s1280_s16 }
  0x3b   : > { %p1006_p8 = scmp.ne.s32.totalorder %s1280_s16, %s1005_s13  ;;  %p1014_p5 = scmp.lt.s32.totalorder %s1005_s13, %s1005_s13 }
  0x3d   : > { %p1008_p13 = pnand %p1006_p8, %p966_p12  ;;  %p1015_p7 = por %p1014_p5, %p1013_p3 }
  0x3f   : > { %p1009_p0 = pneg %p1008_p13 }
  0x41   : > { %p1016_p9 = pnand %p1015_p7, %p1009_p0 }
  0x43   : > { %1019 = shalt.err (!%p1016_p9)
}
  0x44   : > { %854 = dma.hbm_to_vmem [thread:$0]  (!%p1276_p10), %s1513_s2, 1024, %s1280_s16, [#allocation8], %s1156_s17, %s1156_s17, %s1157_s18  }
  0x45   : > { %s32_s10 = sadd.s32 1, %s1144_s26  ;;  %s35_s19 = sadd.s32 1, %s1148_s27 }
  0x46   : > { %p33_p12 = scmp.ge.s32.totalorder %s32_s10, 3  ;;  %s42_s14 = sadd.s32 1, %s1132_s23 }
  0x47   : > { %p49_p11 = scmp.ne.s32.totalorder %s1132_s23, %s1128_s22  ;;  %p50_p1 = scmp.eq.s32.totalorder %s1152_s28, 0 }
  0x48   : > { %s1553_s10 = smov (%p33_p12, %s32_s10), 0  ;;  %s1555_s19 = smov (!%p33_p12, %s35_s19), %s1148_s27 }
  0x49   : > { %s39_s20 = ssub.s32 %s1144_s26, %s1553_s10  ;;  %p1340_p2 = por %p50_p1, %p49_p11 }
  0x4a   : > { %p37_p10 = scmp.ge.s32.totalorder %s1555_s19, 2  ;;  %p40_p4 = scmp.eq.s32.totalorder %s39_s20, 0 }
  0x4b   : > { %p1535_p6 = scmp.ne.s32.totalorder %s1528_s8, 0  ;;  %p865_p13 = scmp.lt.s32.totalorder %s1152_s28, 6 }
  0x4c   : > { %s1557_s19 = smov (%p37_p10, %s1555_s19), 0  ;;  %s245_s18 = sand.u32 1, %s1132_s23  }
  0x4d   : > { %p1346_p8 = por %p1535_p6, %p49_p11  ;;  %s776_s30 = sshll.u32 %s1144_s26, 8 }
  0x4e   : > { %s1354_s17 = scalar_select %p40_p4, %s1132_s23, %s42_s14  }
  0x4f   : > { %s741_s12 = sshll.u32 %s245_s18, 4  ;;  %s1361_s6 = scalar_lea.hbm %s1511_s0, %s776_s30 }
  0x50   : > { %s249_s8 = scalar_lea.vmem [#allocation4], %s741_s12  ;;  %p1365_p0 = pnand %p865_p13, %p1340_p2 }
  0x51   : > { %s256_s21 = sshll.u32 %s249_s8, 4  ;;  %s1371_s14 = scalar_lea.sflag [#allocation5], %s245_s18  ;;  %s1369_s21 = int_to_ptr.vmem [resolvable:$true] %s256_s21 }
  0x52   : > { %s1020_s15 = scalar_lea.hbm %s1361_s6, 256  ;;  %p1022_p5 = pneg %p1365_p0 }
  0x53   : > { %p1021_p3 = scmp.ne.s32.totalorder %s1361_s6, %s1020_s15  ;;  %s1025_s12 = scalar_lea.hbm %s1511_s0, 768 }
  0x54   : > { %p1026_p12 = scmp.lt.u32.totalorder %s1361_s6, %s1511_s0  ;;  %p1027_p11 = scmp.lt.u32.totalorder %s1025_s12, %s1020_s15 }
  0x55   : > { %p1023_p7 = pnand %p1022_p5, %p1021_p3  ;;  %p1029_p2 = scmp.lt.u32.totalorder %s1020_s15, %s1361_s6 }
  0x56   : > { %p1028_p1 = por %p1027_p11, %p1026_p12 }
  0x57   : > { %p1024_p9 = pneg %p1023_p7 }
  0x58   : > { %p1030_p10 = por %p1029_p2, %p1028_p1 }
  0x5a   : > { %p1031_p4 = pnand %p1030_p10, %p1024_p9 }
  0x5c   : > { %1034 = shalt.err (!%p1031_p4)
}
  0x5d   : > { %s1035_s18 = scalar_lea.vmem %s1369_s21, 256  ;;  %s1158_s30 = smov [#allocation4]  }
  0x5e   : > { %p1036_p6 = scmp.ne.s32.totalorder %s1369_s21, %s1035_s18  ;;  %s1040_s29 = sshll.u32 %s1158_s30, 4  ;;  %s1041_s29 = int_to_ptr.vmem [resolvable:$false] %s1040_s29 }
  0x5f   : > { %s1042_s13 = scalar_lea.vmem %s1041_s29, 512  ;;  %p1043_p7 = scmp.lt.s32.totalorder %s1369_s21, %s1041_s29 }
  0x60   : > { %p1038_p13 = pnand %p1036_p6, %p1022_p5  ;;  %p1044_p12 = scmp.lt.s32.totalorder %s1042_s13, %s1035_s18 }
  0x62   : > { %p1039_p3 = pneg %p1038_p13  ;;  %p1045_p11 = por %p1044_p12, %p1043_p7 }
  0x64   : > { %p1046_p1 = pnand %p1045_p11, %p1039_p3 }
  0x66   : > { %1049 = shalt.err (!%p1046_p1)
}
  0x67   : > { %s1159_s15 = smov 128   ;;  %s1160_s12 = smov 8  }
  0x68   : > { %858 = dma.hbm_to_vmem [thread:$0]  (!%p1365_p0), %s1361_s6, 256, %s1369_s21, %s1371_s14, %s1159_s15, %s1159_s15, %s1160_s12  }
  0x69   : > { %p1538_p5 = scmp.ne.s32.totalorder %s1532_s11, 0 }
  0x6a   : > { %s1402_s8 = sand.u32 (!%p1538_p5), 1, %s1128_s22   ;;  %p1539_p9 = scmp.ne.s32.totalorder (!%p1538_p5), %s1529_s9, 0 }
  0x6b   : > { %268 = sbr.rel (%p1538_p5) target bundleno = 672 (0x2a0), region = 44  ;;  %s745_s18 = sshll.u32 (!%p1538_p5), %s1402_s8, 4 }
  0x6c   : > { %s271_s30 = scalar_lea.sflag (!%p1538_p5), [#allocation5], %s1402_s8  ;;  %s1408_s29 = scalar_lea.vmem (!%p1538_p5), [#allocation4], %s745_s18 }
  0x72   : > { %1111 = dma.done.wait (%p1539_p9), %s271_s30, 256  }
  0x73   : > { %1113 = vsyncadd (%p1539_p9), %s271_s30, 4294967040  ;;  %p1540_p0 = scmp.ne.s32.totalorder %s1527_s7, 0 }
  0x75   : > { %1115 = dma.done.wait (%p1540_p0), [#allocation8], 2048  }
  0x76   : > { %1117 = vsyncadd (%p1540_p0), [#allocation8], 4294965248  ;;  %v1161_v0 = vmov 0.0   ;;  %vm1162_vm0 = vmmov 0   ;;  %v946_v1 = vld [vmem:[#allocation7] sm:$0xff]   ;;  %v947_v2 = vld [vmem:[#allocation7 + $0x8] sm:$0xff]  }
  0x77   : > { %796 = vmatprep.subr.bf16.mxu0 %v1161_v0  ;;  %812 = vmatprep.mubr.msk.bf16.mxu0 %vm1162_vm0, %v1161_v0  ;;  %v948_v3 = vld [vmem:[#allocation7 + $0x10] sm:$0xff]   ;;  %v949_v4 = vld [vmem:[#allocation7 + $0x18] sm:$0xff]   ;;  %v950_v5 = vld [vmem:[#allocation7 + $0x20] sm:$0xff]   ;;  %s1426_s7 = scalar_lea.vmem [#allocation10], %s745_s18  ;;  %p757_p2 = scmp.ne.s32.totalorder %s1140_s25, 0 }
  0x78   : > { %797 = vmatpush3.bf16.msra.mxu0 %v946_v1  ;;  %v951_v6 = vld [vmem:[#allocation7 + $0x28] sm:$0xff]   ;;  %v952_v7 = vld [vmem:[#allocation7 + $0x30] sm:$0xff]   ;;  %v953_v8 = vld [vmem:[#allocation7 + $0x38] sm:$0xff]   ;;  %p758_p10 = scmp.ne.s32.totalorder (!%p757_p2), %s1136_s24, 0 }
  0x79   : > { %798 = vmatprep.subr.bf16.mxu0 %v1161_v0  ;;  %v314_v9 = vld [vmem:[%s1408_s29] sm:$0xff]  ;;  %v315_v10 = vld [vmem:[%s1408_s29 + $0x8] sm:$0xff] }
  0x7a   : > { %v316_v11 = vpack.c.bf16 %v315_v10, %v314_v9 }
  0x7c   : > { %799 = vmatpush3.bf16.msra.mxu0 %v947_v2 }
  0x7d   : > { %800 = vmatprep.subr.bf16.mxu0 %v1161_v0 }
  0x80   : > { %801 = vmatpush3.bf16.msra.mxu0 %v948_v3 }
  0x81   : > { %802 = vmatprep.subr.bf16.mxu0 %v1161_v0 }
  0x84   : > { %803 = vmatpush3.bf16.msra.mxu0 %v949_v4 }
  0x85   : > { %804 = vmatprep.subr.bf16.mxu0 %v1161_v0 }
  0x88   : > { %805 = vmatpush3.bf16.msra.mxu0 %v950_v5 }
  0x89   : > { %806 = vmatprep.subr.bf16.mxu0 %v1161_v0 }
  0x8c   : > { %807 = vmatpush3.bf16.msra.mxu0 %v951_v6 }
  0x8d   : > { %808 = vmatprep.subr.bf16.mxu0 %v1161_v0 }
  0x90   : > { %809 = vmatpush3.bf16.msra.mxu0 %v952_v7 }
  0x91   : > { %810 = vmatprep.subr.bf16.mxu0 %v1161_v0 }
  0x94   : > { %811 = vmatpush3.bf16.msra.mxu0 %v953_v8 }
  0x97   : > { %813 = vmatmul.mubr.bf16.vlgmr.msra.gmra.mrb[0].mxu0 %v316_v11 }
 0x167   : > { %425 = sbr.rel (%p757_p2) target bundleno = 392 (0x188), region = 60 }
 0x16a   : > { %v1420_v12 = vpop.f32.mrb[0].mxu0 }
 0x16b   : > { %v814_v13 = vpop.f32.mrb[1].mxu0 }
 0x16c   : > { %v1422_v14 = vpop.f32.mrb[2].mxu0 }
 0x16d   : > { %v815_v15 = vpop.f32.mrb[3].mxu0 }
 0x16e   : > { %429 = sbr.rel (%p758_p10) target bundleno = 373 (0x175), region = 64  ;;  %v1163_v16 = vmov (!%p758_p10), 0.0  }
 0x16f   : > { %430 = vst [vmem:[#allocation2] sm:$0x1] (!%p758_p10), %v1163_v16  ;;  %431 = vst [vmem:[#allocation3] sm:$0x1] (!%p758_p10), %v1163_v16 }
 0x175 PF: > { %v433_v17 = vadd.f32 %v1422_v14, %v1420_v12  ;;  %v443_v18 = vmul.f32 %v1420_v12, %v1420_v12  ;;  %v444_v19 = vmul.f32 %v1422_v14, %v1422_v14 }
 0x176   : > { %v432_v30 = vld [vmem:[#allocation2] sm:$0x1]  ;;  %v442_v33 = vld [vmem:[#allocation3] sm:$0x1] }
 0x177   : > { %v434_v20 = vrot.slane %v433_v17, 4  ;;  %v445_v21 = vadd.f32 %v444_v19, %v443_v18 }
 0x179   : > { %v435_v22 = vadd.f32 %v434_v20, %v433_v17  ;;  %v446_v23 = vrot.slane %v445_v21, 4 }
 0x17b   : > { %v436_v24 = vrot.slane %v435_v22, 2  ;;  %v447_v25 = vadd.f32 %v446_v23, %v445_v21 }
 0x17d   : > { %v437_v26 = vadd.f32 %v436_v24, %v435_v22  ;;  %v448_v27 = vrot.slane %v447_v25, 2 }
 0x17f   : > { %v438_v28 = vrot.slane %v437_v26, 1  ;;  %v449_v29 = vadd.f32 %v448_v27, %v447_v25 }
 0x181   : > { %v439_v31 = vadd.f32 %v438_v28, %v437_v26  ;;  %v450_v32 = vrot.slane %v449_v29, 1 }
 0x183   : > { %v440_v34 = vadd.f32 %v439_v31, %v432_v30  ;;  %v451_v35 = vadd.f32 %v450_v32, %v449_v29 }
 0x185   : > { %441 = vst [vmem:[#allocation2] sm:$0x1] %v440_v34  ;;  %v452_v36 = vadd.f32 %v451_v35, %v442_v33 }
 0x187   : > { %453 = vst [vmem:[#allocation3] sm:$0x1] %v452_v36 }
 0x188 PF: > { %p759_p4 = scmp.ne.s32.totalorder %s1140_s25, 1 }
 0x189   : > { %v954_v37 = vld [vmem:[#allocation9] sm:$0xff] (!%p759_p4)   ;;  %v1164_v38 = vmov (!%p759_p4), 0.0   ;;  %v955_v39 = vld [vmem:[#allocation9 + $0x8] sm:$0xff] (!%p759_p4)   ;;  %vm1165_vm1 = vmmov (!%p759_p4), 0   ;;  %v956_v40 = vld [vmem:[#allocation9 + $0x10] sm:$0xff] (!%p759_p4)   ;;  %v466_v47 = vlaneseq (!%p759_p4) }
 0x18a   : > { %457 = sbr.rel (%p759_p4) target bundleno = 647 (0x287), region = 68  ;;  %816 = vmatprep.subr.bf16.mxu0 (!%p759_p4), %v1164_v38  ;;  %832 = vmatprep.mubr.msk.bf16.mxu0 (!%p759_p4), %vm1165_vm1, %v1164_v38  ;;  %v957_v45 = vld [vmem:[#allocation9 + $0x18] sm:$0xff] (!%p759_p4)   ;;  %v958_v49 = vld [vmem:[#allocation9 + $0x20] sm:$0xff] (!%p759_p4)   ;;  %v959_v53 = vld [vmem:[#allocation9 + $0x28] sm:$0xff] (!%p759_p4)  }
 0x18b   : > { %817 = vmatpush3.bf16.msra.mxu0 (!%p759_p4), %v954_v37  ;;  %v467_v51 = vshrl.u32 (!%p759_p4), %v466_v47, 7  ;;  %v960_v55 = vld [vmem:[#allocation9 + $0x30] sm:$0xff] (!%p759_p4)   ;;  %v961_v57 = vld [vmem:[#allocation9 + $0x38] sm:$0xff] (!%p759_p4)  }
 0x18c   : > { %818 = vmatprep.subr.bf16.mxu0 (!%p759_p4), %v1164_v38  ;;  %v458_v41 = vld [vmem:[#allocation2] sm:$0x1] (!%p759_p4) }
 0x18d   : > { %v459_v43 = vmul.f32 (!%p759_p4), 0.025, %v458_v41  ;;  %v468_v54 = vsub.s32 (!%p759_p4), 0, %v467_v51  ;;  %v760_v62 = vld [vmem:[%s1515_s4] ss:$0 sm:$0xff] (!%p759_p4) }
 0x18e   : > { %v460_v42 = vld [vmem:[#allocation3] sm:$0x1] (!%p759_p4)  ;;  %v761_v1 = vld [vmem:[%s1516_s5] ss:$0 sm:$0xff] (!%p759_p4) }
 0x18f   : > { %819 = vmatpush3.bf16.msra.mxu0 (!%p759_p4), %v955_v39  ;;  %v461_v44 = vmul.f32 (!%p759_p4), 0.025, %v460_v42  ;;  %v462_v46 = vmul.f32 (!%p759_p4), %v459_v43, %v459_v43  ;;  %v469_v56 = vrot.slane (!%p759_p4), %v459_v43, %v468_v54  ;;  %v762_v9 = vld [vmem:[%s1514_s3] ss:$0 sm:$0xff] (!%p759_p4) }
 0x190   : > { %820 = vmatprep.subr.bf16.mxu0 (!%p759_p4), %v1164_v38 }
 0x191   : > { %v463_v48 = vsub.f32 %v461_v44, %v462_v46  ;;  %v471_v58 = vsub.f32 %v1420_v12, %v469_v56  ;;  %v472_v59 = vsub.f32 %v1422_v14, %v469_v56 }
 0x193   : > { %821 = vmatpush3.bf16.msra.mxu0 %v956_v40  ;;  %v464_v50 = vmax.f32 %v463_v48, 0.0 }
 0x194   : > { %822 = vmatprep.subr.bf16.mxu0 %v1164_v38 }
 0x195   : > { %v473_v52 = vadd.f32 1e-05, %v464_v50 }
 0x197   : > { %823 = vmatpush3.bf16.msra.mxu0 %v957_v45  ;;  %962 = vrsqrt.f32 %v473_v52 }
 0x198   : > { %824 = vmatprep.subr.bf16.mxu0 %v1164_v38 }
 0x19b   : > { %825 = vmatpush3.bf16.msra.mxu0 %v958_v49 }
 0x19c   : > { %826 = vmatprep.subr.bf16.mxu0 %v1164_v38 }
 0x19f   : > { %827 = vmatpush3.bf16.msra.mxu0 %v959_v53 }
 0x1a0   : > { %828 = vmatprep.subr.bf16.mxu0 %v1164_v38 }
 0x1a1   : > { %v963_v60 = vpop.eup %962 }
 0x1a2   : > { %v479_v61 = vrot.slane %v963_v60, %v468_v54 }
 0x1a3   : > { %829 = vmatpush3.bf16.msra.mxu0 %v960_v55 }
 0x1a4   : > { %830 = vmatprep.subr.bf16.mxu0 %v1164_v38  ;;  %v481_v63 = vmul.f32 %v479_v61, %v471_v58  ;;  %v482_v0 = vmul.f32 %v479_v61, %v472_v59 }
 0x1a6   : > { %v490_v2 = vmul.f32 %v760_v62, %v481_v63  ;;  %v491_v3 = vmul.f32 %v760_v62, %v482_v0 }
 0x1a7   : > { %831 = vmatpush3.bf16.msra.mxu0 %v961_v57 }
 0x1a8   : > { %v499_v4 = vadd.f32 %v761_v1, %v490_v2  ;;  %v500_v5 = vadd.f32 %v761_v1, %v491_v3 }
 0x1aa   : > { %v501_v6 = vmax.f32 %v499_v4, 0.0  ;;  %v502_v7 = vmax.f32 %v500_v5, 0.0 }
 0x1ac   : > { %v503_v8 = vpack.c.bf16 %v502_v7, %v501_v6 }
 0x1ae   : > { %833 = vmatmul.mubr.bf16.vlgmr.msra.gmra.mrb[0].mxu0 %v503_v8 }
 0x281   : > { %v609_v10 = vpop.f32.mrb[0].mxu0 }
 0x282   : > { %v610_v11 = vadd.f32 %v762_v9, %v609_v10  ;;  %v834_v12 = vpop.f32.mrb[1].mxu0 }
 0x283   : > { %v612_v13 = vpop.f32.mrb[2].mxu0 }
 0x284   : > { %616 = vst [vmem:[%s1426_s7] sm:$0xff] %v610_v11  ;;  %v613_v14 = vadd.f32 %v762_v9, %v612_v13  ;;  %v835_v15 = vpop.f32.mrb[3].mxu0 }
 0x286   : > { %617 = vst [vmem:[%s1426_s7 + $0x8] sm:$0xff] %v613_v14 }
 0x287 PF: > { %s777_s14 = sshll.u32 %s1136_s24, 8  ;;  %s1541_s12 = sld [smem:[#allocation16_spill]] }
 0x288   : > { %s632_s30 = sshll.u32 %s1426_s7, 4  ;;  %s619_s29 = scalar_lea.sflag [#allocation6], %s1402_s8  ;;  %s1457_s30 = int_to_ptr.vmem [resolvable:$true] %s632_s30 }
 0x289   : > { %s1050_s25 = scalar_lea.vmem %s1457_s30, 256  ;;  %s1166_s9 = smov [#allocation10]  }
 0x28a   : > { %p1051_p6 = scmp.ne.s32.totalorder %s1457_s30, %s1050_s25  ;;  %s1054_s11 = sshll.u32 %s1166_s9, 4  ;;  %s1055_s11 = int_to_ptr.vmem [resolvable:$false] %s1054_s11 }
 0x28b   : > { %s1056_s24 = scalar_lea.vmem %s1055_s11, 512  ;;  %p1057_p7 = scmp.lt.s32.totalorder %s1457_s30, %s1055_s11 }
 0x28c   : > { %p1052_p13 = pnand %p1051_p6, %p1346_p8  ;;  %p1058_p12 = scmp.lt.s32.totalorder %s1056_s24, %s1050_s25 }
 0x28d   : > { %s1454_s18 = scalar_lea.hbm %s1541_s12, %s777_s14 }
 0x28e   : > { %p1053_p3 = pneg %p1052_p13  ;;  %p1059_p11 = por %p1058_p12, %p1057_p7 }
 0x290   : > { %p1060_p1 = pnand %p1059_p11, %p1053_p3 }
 0x292   : > { %1063 = shalt.err (!%p1060_p1)
}
 0x293   : > { %s1064_s7 = scalar_lea.hbm %s1454_s18, 256  ;;  %s1068_s20 = scalar_lea.hbm %s1541_s12, 768 }
 0x294   : > { %p1065_p5 = scmp.ne.s32.totalorder %s1454_s18, %s1064_s7  ;;  %p1069_p2 = scmp.lt.u32.totalorder %s1454_s18, %s1541_s12 }
 0x295   : > { %p1070_p10 = scmp.lt.u32.totalorder %s1068_s20, %s1064_s7  ;;  %p1072_p6 = scmp.lt.u32.totalorder %s1064_s7, %s1454_s18 }
 0x296   : > { %p1066_p9 = pnand %p1065_p5, %p1346_p8 }
 0x297   : > { %p1071_p4 = por %p1070_p10, %p1069_p2 }
 0x298   : > { %p1067_p0 = pneg %p1066_p9 }
 0x299   : > { %p1073_p13 = por %p1072_p6, %p1071_p4 }
 0x29b   : > { %p1074_p3 = pnand %p1073_p13, %p1067_p0 }
 0x29d   : > { %1077 = shalt.err (!%p1074_p3)
}
 0x29e   : > { %s1167_s15 = smov 128   ;;  %s1168_s25 = smov 8  }
 0x29f   : > { %846 = dma.vmem_to_hbm [thread:$0]  (%p1346_p8), %s1457_s30, 256, %s1454_s18, %s619_s29, %s1167_s15, %s1167_s15, %s1168_s25  }
 0x2a0 PF: > { %s1542_s9 = sld [smem:[#allocation14_spill]]  ;;  %s1543_s11 = sld [smem:[#allocation15_spill]] }
 0x2a1   : > { %p868_p7 = scmp.ge.s32.totalorder %s1152_s28, 2 }
 0x2a6   : > { %s647_s24 = sand.u32 1, %s1542_s9   ;;  %p1544_p12 = scmp.ne.s32.totalorder %s1543_s11, 0 }
 0x2a7   : > { %s648_s7 = scalar_lea.sflag [#allocation6], %s647_s24 }
 0x2a8   : > { %p860_p11 = pnand %p868_p7, %p1544_p12 }
 0x2aa   : > { %1119 = dma.done.wait (!%p860_p11), %s648_s7, 256  }
 0x2ab   : > { %1121 = vsyncadd (!%p860_p11), %s648_s7, 4294967040  ;;  %s23_s28 = sadd.s32 1, %s1152_s28   ;;  %s1545_s21 = smov %s1128_s22 }
 0x2ac   : > { %p20_p1 = scmp.ge.s32.totalorder %s23_s28, 8   ;;  %s1546_s22 = smov %s1132_s23 }
 0x2ad   : > { %s1547_s23 = smov %s1354_s17  ;;  %s1548_s24 = smov %s1144_s26 }
 0x2ae   : > { %s1549_s25 = smov %s1148_s27  ;;  %s1550_s26 = smov %s1553_s10 }
 0x2af   : > { %s1551_s27 = smov %s1557_s19  ;;  %22 = sbr.rel (!%p20_p1) target bundleno = 10 (0xa), region = 109 }
 0x2b6   :  { %653 = vsyncpa [#allocation5], 1 }
 0x2b7   :  { %655 = vsyncpa [#allocation5 + $0x1], 1 }
 0x2b8   :  { %656 = vsyncpa [#allocation8], 1 }
 0x2b9   :  { %657 = vsyncpa [#allocation6], 1 }
 0x2ba   :  { %659 = vsyncpa [#allocation6 + $0x1], 1 }

</bundles_post_ra>
